<compile_context>
chip_gen: v5e
topology: v5e:2x2
jax: 0.10.0
libtpu: 0.0.40
codegen_flags: <defaults>
</compile_context>

<pallas_src>
import functools
import math

import jax
import jax.numpy as jnp
from jax.experimental import pallas as pl
from jax.experimental.pallas import tpu as pltpu

_HALO = 8   # sublane-aligned zero halo -> 'same' conv padding lives in VMEM


def _round_up(x, m):
    return ((x + m - 1) // m) * m


# ----------------------------------------------------------------------------
# Fused kernel: all ConvBlocks (weight-normed conv + bias + ReLU + residual)
# executed back-to-back on a VMEM-resident activation for one batch tile.
# ----------------------------------------------------------------------------
def _convnet_kernel(*refs, K, pad, L, LP, NB, cps, layer_has_down, residual,
                    mxu_dtype):
    num_layers = len(layer_has_down)
    x_ref = refs[0]
    pos = 1
    layer_refs = []
    for hd in layer_has_down:
        n = 4 if hd else 2
        layer_refs.append(refs[pos:pos + n])
        pos += n
    o_ref = refs[pos]
    act = refs[pos + 1]                       # (NB, 2*_HALO + LP, CPmax) f32
    CPmax = act.shape[-1]
    CP0 = cps[0]
    M = NB * LP

    # Zero ONLY the halo rows; the valid rows get the (already zero-padded) input.
    act[:, :_HALO, :] = jnp.zeros((NB, _HALO, CPmax), act.dtype)
    act[:, _HALO + LP:, :] = jnp.zeros((NB, _HALO, CPmax), act.dtype)
    act[:, _HALO:_HALO + LP, :CP0] = x_ref[...].astype(act.dtype)

    for li in range(num_layers):
        cin, cout = cps[li], cps[li + 1]      # per-layer lane-padded widths
        if layer_has_down[li]:
            w_ref, b_ref, wd_ref, bd_ref = layer_refs[li]
        else:
            w_ref, b_ref = layer_refs[li]

        if cin == 128:
            # K shifted windows concatenated on the lane axis -> one matmul
            # with contraction K*128 (fills the MXU depth on v6e/v7x).
            cols = jnp.concatenate(
                [act[:, _HALO - pad + k:_HALO - pad + k + LP, :cin]
                 for k in range(K)], axis=-1)
            cols = cols.reshape(M, K * cin).astype(mxu_dtype)
            acc = jnp.dot(cols, w_ref[...], preferred_element_type=jnp.float32)
        else:
            # Wide layers: per-tap accumulation, no (M, K*cin) temporary.
            acc = None
            for k in range(K):
                win = act[:, _HALO - pad + k:_HALO - pad + k + LP, :cin]
                win = win.reshape(M, cin).astype(mxu_dtype)
                part = jnp.dot(win, w_ref[k * cin:(k + 1) * cin, :],
                               preferred_element_type=jnp.float32)
                acc = part if acc is None else acc + part

        acc = acc + b_ref[...]                # (1, cout) broadcast
        acc = jnp.maximum(acc, 0.0)           # ReLU

        if residual:
            res = act[:, _HALO:_HALO + LP, :cin].reshape(M, cin)
            if layer_has_down[li]:            # 1x1 down-sample conv
                acc = acc + (jnp.dot(res.astype(mxu_dtype), wd_ref[...],
                                     preferred_element_type=jnp.float32)
                             + bd_ref[...])
            else:                             # identity residual stays f32-exact
                acc = acc + res

        out3 = acc.reshape(NB, LP, cout)
        if li == num_layers - 1:
            o_ref[...] = out3.astype(o_ref.dtype)
        else:
            act[:, _HALO:_HALO + LP, :cout] = out3.astype(act.dtype)
            if LP > L:
                # keep the L..LP pad rows zero so they keep acting as 'same' padding
                act[:, _HALO + L:_HALO + LP, :] = jnp.zeros(
                    (NB, LP - L, CPmax), act.dtype)


def conv_net_apply(x_ncl, params, *, kernel_size=3, residual=True,
                   mxu_dtype=jnp.bfloat16):
    """x_ncl: (N, C, L) float32 (PyTorch layout). Returns (N, C_last, L)."""
    K = kernel_size
    pad = (K - 1) // 2
    assert K % 2 == 1, "ConvNet 'same' conv / residual add requires odd kernel_size"
    assert pad <= _HALO
    N, C0, L = x_ncl.shape
    channels = [C0] + [p["w_v"].shape[0] for p in params]
    cps = [_round_up(c, 128) for c in channels]   # per-layer lane-dense widths
    CPmax = max(cps)
    LP = _round_up(L, 8)                          # sublane-aligned sequence length

    # Batch tile: at least 2 tiles when possible (megacore on v7x), bounded VMEM.
    NB = N
    if N > 1:
        for d in range(N // 2, 0, -1):
            if N % d == 0:
                NB = d
                break
    while NB > 1 and NB % 2 == 0 and NB * (2 * _HALO + LP) * CPmax * 4 > (16 << 20):
        NB //= 2

    # Channels-last + pad L and channel dims (one cheap XLA op for the whole net).
    x = jnp.transpose(x_ncl, (0, 2, 1)).astype(jnp.float32)
    x = jnp.pad(x, ((0, 0), (0, LP - L), (0, cps[0] - C0)))

    args = [x]
    in_specs = [pl.BlockSpec((NB, LP, cps[0]), lambda b: (b, 0, 0))]
    layer_has_down = []
    weight_bytes = 0

    for li, p in enumerate(params):
        c_in, c_out = channels[li], channels[li + 1]
        CPi, CPo = cps[li], cps[li + 1]
        w_v, w_g, b = p["w_v"], p["w_g"], p["b"]
        # weight_norm reparam (glue, plain JAX): w = g * v / ||v||, norm over (Cin, K)
        norm = jnp.sqrt(jnp.sum(w_v.astype(jnp.float32) ** 2, axis=(1, 2),
                                keepdims=True))
        w_eff = (w_g.reshape(-1, 1, 1) * w_v) / norm            # (c_out, c_in, K)
        w_taps = jnp.transpose(w_eff, (2, 1, 0))                # (K, c_in, c_out)
        w_taps = jnp.pad(w_taps, ((0, 0), (0, CPi - c_in), (0, CPo - c_out)))
        w_mat = w_taps.reshape(K * CPi, CPo).astype(mxu_dtype)  # row = k*CPi + c_in
        b_pad = jnp.pad(b.astype(jnp.float32), (0, CPo - c_out)).reshape(1, CPo)
        args += [w_mat, b_pad]
        in_specs += [pl.BlockSpec((K * CPi, CPo), lambda b: (0, 0)),
                     pl.BlockSpec((1, CPo), lambda b: (0, 0))]
        weight_bytes += int(w_mat.size) * w_mat.dtype.itemsize + int(b_pad.size) * 4

        has_down = residual and (c_in != c_out)
        layer_has_down.append(has_down)
        if has_down:
            wd = p["wd"][:, :, 0]                               # (c_out, c_in)
            wd_mat = jnp.pad(jnp.transpose(wd, (1, 0)).astype(jnp.float32),
                             ((0, CPi - c_in), (0, CPo - c_out))).astype(mxu_dtype)
            bd_pad = jnp.pad(p["bd"].astype(jnp.float32),
                             (0, CPo - c_out)).reshape(1, CPo)
            args += [wd_mat, bd_pad]
            in_specs += [pl.BlockSpec((CPi, CPo), lambda b: (0, 0)),
                         pl.BlockSpec((1, CPo), lambda b: (0, 0))]
            weight_bytes += (int(wd_mat.size) * wd_mat.dtype.itemsize
                             + int(bd_pad.size) * 4)

    # VMEM budget: scratch + (double-buffered) x/out blocks + weights.
    scratch_bytes = NB * (2 * _HALO + LP) * CPmax * 4
    io_bytes = 2 * NB * LP * cps[0] * 4 + 2 * NB * LP * cps[-1] * 4
    footprint = scratch_bytes + io_bytes + 2 * weight_bytes
    vmem_limit = int(min(max(footprint + footprint // 4 + (2 << 20), 8 << 20),
                         100 << 20))

    kernel = functools.partial(
        _convnet_kernel, K=K, pad=pad, L=L, LP=LP, NB=NB, cps=tuple(cps),
        layer_has_down=tuple(layer_has_down), residual=residual,
        mxu_dtype=mxu_dtype)

    out = pl.pallas_call(
        kernel,
        out_shape=jax.ShapeDtypeStruct((N, LP, cps[-1]), jnp.float32),
        grid=(N // NB,),
        in_specs=in_specs,
        out_specs=pl.BlockSpec((NB, LP, cps[-1]), lambda b: (b, 0, 0)),
        scratch_shapes=[pltpu.VMEM((NB, 2 * _HALO + LP, CPmax), jnp.float32)],
        compiler_params=pltpu.CompilerParams(
            dimension_semantics=("parallel",),
            vmem_limit_bytes=vmem_limit),
    )(*args)

    y = out[:, :L, :channels[-1]]             # drop L / channel padding
    return jnp.transpose(y, (0, 2, 1))        # back to (N, C, L)


# ----------------------------------------------------------------------------
# Parameter init (matches the PyTorch module's init scheme).
# TODO(synk): nn.Dropout is stochastic in train mode; implemented here as
#             eval-mode identity.
# ----------------------------------------------------------------------------
def init_conv_net_params(key, channels, kernel_size=3, residual=True):
    params = []
    num_levels = len(channels) - 1
    for i in range(num_levels):
        c_in, c_out = channels[i], channels[i + 1]
        key, k1, k2 = jax.random.split(key, 3)
        fan_in = c_in * kernel_size
        bound = math.sqrt(6.0 / fan_in)       # kaiming_uniform, relu
        w_v = jax.random.uniform(k1, (c_out, c_in, kernel_size),
                                 jnp.float32, -bound, bound)
        w_g = jnp.sqrt(jnp.sum(w_v ** 2, axis=(1, 2)))   # weight_norm init
        b = jnp.zeros((c_out,), jnp.float32)
        layer = {"w_v": w_v, "w_g": w_g, "b": b}
        if residual and c_in != c_out:
            bound_d = math.sqrt(6.0 / c_in)
            layer["wd"] = jax.random.uniform(k2, (c_out, c_in, 1),
                                             jnp.float32, -bound_d, bound_d)
            layer["bd"] = jnp.zeros((c_out,), jnp.float32)
        params.append(layer)
    return params


# ----------------------------------------------------------------------------
# Pure-JAX reference (lax conv, f32) for the correctness checks.
# ----------------------------------------------------------------------------
def conv_net_reference(x_ncl, params, *, kernel_size=3, residual=True):
    padding = (kernel_size - 1) // 2
    x = x_ncl
    for layer in params:
        w_v, w_g, b = layer["w_v"], layer["w_g"], layer["b"]
        norm = jnp.sqrt(jnp.sum(w_v ** 2, axis=(1, 2), keepdims=True))
        w = (w_g.reshape(-1, 1, 1) * w_v) / norm
        y = jax.lax.conv_general_dilated(
            x, w, window_strides=(1,), padding=[(padding, padding)],
            dimension_numbers=("NCH", "OIH", "NCH"))
        y = y + b.reshape(1, -1, 1)
        y = jnp.maximum(y, 0.0)
        if residual:
            if "wd" in layer:
                r = jax.lax.conv_general_dilated(
                    x, layer["wd"], window_strides=(1,), padding=[(0, 0)],
                    dimension_numbers=("NCH", "OIH", "NCH"))
                r = r + layer["bd"].reshape(1, -1, 1)
            else:
                r = x
            y = y + r
        x = y
    return x


if __name__ == "__main__":
    key = jax.random.PRNGKey(0)
    k_x, k_p, k_x2, k_p2, k_x3, k_p3 = jax.random.split(key, 6)
    kernel_size = 3

    # Config 1: ConvNet([4, 8, 16]) (1x1 down-sample residuals), bf16 MXU path.
    channels = [4, 8, 16]
    x = jax.random.normal(k_x, (2, channels[0], 16), jnp.float32)
    params = init_conv_net_params(k_p, channels, kernel_size=kernel_size,
                                  residual=True)
    out = jax.block_until_ready(
        conv_net_apply(x, params, kernel_size=kernel_size, residual=True))
    ref = conv_net_reference(x, params, kernel_size=kernel_size, residual=True)
    assert out.shape == (2, channels[-1], 16), out.shape
    assert jnp.allclose(out, ref, atol=5e-2, rtol=5e-2), "mismatch (cfg1, bf16)"

    # Same config, f32 MXU path: exact parity with the reference.
    out_f32 = jax.block_until_ready(
        conv_net_apply(x, params, kernel_size=kernel_size, residual=True,
                       mxu_dtype=jnp.float32))
    assert jnp.allclose(out_f32, ref, atol=1e-4, rtol=1e-4), "mismatch (cfg1, f32)"

    # Config 2: ConvNet([8, 8, 16]) exercises the identity-residual path (bf16).
    channels2 = [8, 8, 16]
    x2 = jax.random.normal(k_x2, (2, channels2[0], 16), jnp.float32)
    params2 = init_conv_net_params(k_p2, channels2, kernel_size=kernel_size,
                                   residual=True)
    out2 = jax.block_until_ready(
        conv_net_apply(x2, params2, kernel_size=kernel_size, residual=True))
    ref2 = conv_net_reference(x2, params2, kernel_size=kernel_size, residual=True)
    assert out2.shape == (2, channels2[-1], 16), out2.shape
    assert jnp.allclose(out2, ref2, atol=5e-2, rtol=5e-2), "mismatch (cfg2, bf16)"

    # Config 3: ConvNet([4, 256, 256]) exercises per-layer channel padding
    # (CP=128 and CP=256 in the same call) and the per-tap accumulation path,
    # checked in the exact f32 mode.
    channels3 = [4, 256, 256]
    x3 = jax.random.normal(k_x3, (2, channels3[0], 16), jnp.float32)
    params3 = init_conv_net_params(k_p3, channels3, kernel_size=kernel_size,
                                   residual=True)
    out3 = jax.block_until_ready(
        conv_net_apply(x3, params3, kernel_size=kernel_size, residual=True,
                       mxu_dtype=jnp.float32))
    ref3 = conv_net_reference(x3, params3, kernel_size=kernel_size, residual=True)
    assert out3.shape == (2, channels3[-1], 16), out3.shape
    assert jnp.allclose(out3, ref3, atol=1e-3, rtol=1e-3), "mismatch (cfg3, f32)"

    print("KERNEL_OK")
</pallas_src>

<mosaic_0001>
module attributes {stable_mosaic.version = 11 : i64} {
  func.func @_convnet_kernel(%arg0: i32, %arg1: memref<1x16x128xf32, #tpu.memory_space<vmem>>, %arg2: memref<384x128xbf16, #tpu.memory_space<vmem>>, %arg3: memref<1x128xf32, #tpu.memory_space<vmem>>, %arg4: memref<128x128xbf16, #tpu.memory_space<vmem>>, %arg5: memref<1x128xf32, #tpu.memory_space<vmem>>, %arg6: memref<384x128xbf16, #tpu.memory_space<vmem>>, %arg7: memref<1x128xf32, #tpu.memory_space<vmem>>, %arg8: memref<128x128xbf16, #tpu.memory_space<vmem>>, %arg9: memref<1x128xf32, #tpu.memory_space<vmem>>, %arg10: memref<1x16x128xf32, #tpu.memory_space<vmem>>, %arg11: memref<1x32x128xf32, #tpu.memory_space<vmem>>) attributes {dimension_semantics = [#tpu.dimension_semantics<parallel>], iteration_bounds = array<i64: 2>, scalar_prefetch = 0 : i64, scratch_operands = 1 : i64, tpu.core_type = #tpu.core_type<tc>, window_params = [{transform_indices = @transform_0, window_bounds = array<i64: 1, 16, 128>}, {pipeline_mode = #tpu.pipeline_mode<synchronous>, transform_indices = @transform_1, window_bounds = array<i64: 384, 128>}, {pipeline_mode = #tpu.pipeline_mode<synchronous>, transform_indices = @transform_2, window_bounds = array<i64: 1, 128>}, {pipeline_mode = #tpu.pipeline_mode<synchronous>, transform_indices = @transform_3, window_bounds = array<i64: 128, 128>}, {pipeline_mode = #tpu.pipeline_mode<synchronous>, transform_indices = @transform_4, window_bounds = array<i64: 1, 128>}, {pipeline_mode = #tpu.pipeline_mode<synchronous>, transform_indices = @transform_5, window_bounds = array<i64: 384, 128>}, {pipeline_mode = #tpu.pipeline_mode<synchronous>, transform_indices = @transform_6, window_bounds = array<i64: 1, 128>}, {pipeline_mode = #tpu.pipeline_mode<synchronous>, transform_indices = @transform_7, window_bounds = array<i64: 128, 128>}, {pipeline_mode = #tpu.pipeline_mode<synchronous>, transform_indices = @transform_8, window_bounds = array<i64: 1, 128>}, {transform_indices = @transform_9, window_bounds = array<i64: 1, 16, 128>}]} {
    %cst = arith.constant 0.000000e+00 : f32
    %0 = vector.broadcast %cst : f32 to vector<1x8x128xf32>
    %c0 = arith.constant 0 : index
    %c0_0 = arith.constant 0 : index
    %c0_1 = arith.constant 0 : index
    %1 = vector.load %arg11[%c0, %c0_0, %c0_1] : memref<1x32x128xf32, #tpu.memory_space<vmem>>, vector<1x8x128xf32>
    tpu.vector_store %arg11[%c0, %c0_0, %c0_1], %0 {strides = array<i32>} : memref<1x32x128xf32, #tpu.memory_space<vmem>>, vector<1x8x128xf32>,
    %cst_2 = arith.constant 0.000000e+00 : f32
    %2 = vector.broadcast %cst_2 : f32 to vector<1x8x128xf32>
    %c0_3 = arith.constant 0 : index
    %c24 = arith.constant 24 : index
    %c0_4 = arith.constant 0 : index
    %3 = vector.load %arg11[%c0_3, %c24, %c0_4] : memref<1x32x128xf32, #tpu.memory_space<vmem>>, vector<1x8x128xf32>
    tpu.vector_store %arg11[%c0_3, %c24, %c0_4], %2 {strides = array<i32>} : memref<1x32x128xf32, #tpu.memory_space<vmem>>, vector<1x8x128xf32>,
    %c0_5 = arith.constant 0 : index
    %c0_6 = arith.constant 0 : index
    %c0_7 = arith.constant 0 : index
    %4 = vector.load %arg1[%c0_5, %c0_6, %c0_7] : memref<1x16x128xf32, #tpu.memory_space<vmem>>, vector<1x16x128xf32>
    %c0_8 = arith.constant 0 : index
    %c8 = arith.constant 8 : index
    %c0_9 = arith.constant 0 : index
    %5 = vector.load %arg11[%c0_8, %c8, %c0_9] : memref<1x32x128xf32, #tpu.memory_space<vmem>>, vector<1x16x128xf32>
    tpu.vector_store %arg11[%c0_8, %c8, %c0_9], %4 {strides = array<i32>} : memref<1x32x128xf32, #tpu.memory_space<vmem>>, vector<1x16x128xf32>,
    %c0_10 = arith.constant 0 : index
    %c7 = arith.constant 7 : index
    %c0_11 = arith.constant 0 : index
    %6 = vector.load %arg11[%c0_10, %c7, %c0_11] : memref<1x32x128xf32, #tpu.memory_space<vmem>>, vector<1x16x128xf32>
    %c0_12 = arith.constant 0 : index
    %c8_13 = arith.constant 8 : index
    %c0_14 = arith.constant 0 : index
    %7 = vector.load %arg11[%c0_12, %c8_13, %c0_14] : memref<1x32x128xf32, #tpu.memory_space<vmem>>, vector<1x16x128xf32>
    %c0_15 = arith.constant 0 : index
    %c9 = arith.constant 9 : index
    %c0_16 = arith.constant 0 : index
    %8 = vector.load %arg11[%c0_15, %c9, %c0_16] : memref<1x32x128xf32, #tpu.memory_space<vmem>>, vector<1x16x128xf32>
    %9 = tpu.concatenate %6, %7, %8 in 2 : vector<1x16x128xf32>, vector<1x16x128xf32>, vector<1x16x128xf32> -> vector<1x16x384xf32>
    %10 = vector.shape_cast %9 : vector<1x16x384xf32> to vector<16x384xf32>
    %11 = arith.truncf %10 : vector<16x384xf32> to vector<16x384xbf16>
    %c0_17 = arith.constant 0 : index
    %c0_18 = arith.constant 0 : index
    %12 = vector.load %arg2[%c0_17, %c0_18] : memref<384x128xbf16, #tpu.memory_space<vmem>>, vector<384x128xbf16>
    %cst_19 = arith.constant dense<0.000000e+00> : vector<16x128xf32>
    %13 = tpu.matmul %11, %12, %cst_19 {dimension_numbers = #tpu.dot_dimension_numbers<[1], [0], [0], [1], [0, 0, 1, 1], [], []>} : vector<16x384xbf16>, vector<384x128xbf16>, vector<16x128xf32> -> vector<16x128xf32>
    %c0_20 = arith.constant 0 : index
    %c0_21 = arith.constant 0 : index
    %14 = vector.load %arg3[%c0_20, %c0_21] : memref<1x128xf32, #tpu.memory_space<vmem>>, vector<1x128xf32>
    %15 = vector.broadcast %14 : vector<1x128xf32> to vector<16x128xf32>
    %16 = arith.addf %13, %15 : vector<16x128xf32>
    %cst_22 = arith.constant 0.000000e+00 : f32
    %17 = vector.broadcast %cst_22 : f32 to vector<16x128xf32>
    %18 = arith.maximumf %16, %17 : vector<16x128xf32>
    %c0_23 = arith.constant 0 : index
    %c8_24 = arith.constant 8 : index
    %c0_25 = arith.constant 0 : index
    %19 = vector.load %arg11[%c0_23, %c8_24, %c0_25] : memref<1x32x128xf32, #tpu.memory_space<vmem>>, vector<1x16x128xf32>
    %20 = vector.shape_cast %19 : vector<1x16x128xf32> to vector<16x128xf32>
    %21 = arith.truncf %20 : vector<16x128xf32> to vector<16x128xbf16>
    %c0_26 = arith.constant 0 : index
    %c0_27 = arith.constant 0 : index
    %22 = vector.load %arg4[%c0_26, %c0_27] : memref<128x128xbf16, #tpu.memory_space<vmem>>, vector<128x128xbf16>
    %cst_28 = arith.constant dense<0.000000e+00> : vector<16x128xf32>
    %23 = tpu.matmul %21, %22, %cst_28 {dimension_numbers = #tpu.dot_dimension_numbers<[1], [0], [0], [1], [0, 0, 1, 1], [], []>} : vector<16x128xbf16>, vector<128x128xbf16>, vector<16x128xf32> -> vector<16x128xf32>
    %c0_29 = arith.constant 0 : index
    %c0_30 = arith.constant 0 : index
    %24 = vector.load %arg5[%c0_29, %c0_30] : memref<1x128xf32, #tpu.memory_space<vmem>>, vector<1x128xf32>
    %25 = vector.broadcast %24 : vector<1x128xf32> to vector<16x128xf32>
    %26 = arith.addf %23, %25 : vector<16x128xf32>
    %27 = arith.addf %18, %26 : vector<16x128xf32>
    %28 = vector.shape_cast %27 : vector<16x128xf32> to vector<1x16x128xf32>
    %c0_31 = arith.constant 0 : index
    %c8_32 = arith.constant 8 : index
    %c0_33 = arith.constant 0 : index
    %29 = vector.load %arg11[%c0_31, %c8_32, %c0_33] : memref<1x32x128xf32, #tpu.memory_space<vmem>>, vector<1x16x128xf32>
    tpu.vector_store %arg11[%c0_31, %c8_32, %c0_33], %28 {strides = array<i32>} : memref<1x32x128xf32, #tpu.memory_space<vmem>>, vector<1x16x128xf32>,
    %c0_34 = arith.constant 0 : index
    %c7_35 = arith.constant 7 : index
    %c0_36 = arith.constant 0 : index
    %30 = vector.load %arg11[%c0_34, %c7_35, %c0_36] : memref<1x32x128xf32, #tpu.memory_space<vmem>>, vector<1x16x128xf32>
    %c0_37 = arith.constant 0 : index
    %c8_38 = arith.constant 8 : index
    %c0_39 = arith.constant 0 : index
    %31 = vector.load %arg11[%c0_37, %c8_38, %c0_39] : memref<1x32x128xf32, #tpu.memory_space<vmem>>, vector<1x16x128xf32>
    %c0_40 = arith.constant 0 : index
    %c9_41 = arith.constant 9 : index
    %c0_42 = arith.constant 0 : index
    %32 = vector.load %arg11[%c0_40, %c9_41, %c0_42] : memref<1x32x128xf32, #tpu.memory_space<vmem>>, vector<1x16x128xf32>
    %33 = tpu.concatenate %30, %31, %32 in 2 : vector<1x16x128xf32>, vector<1x16x128xf32>, vector<1x16x128xf32> -> vector<1x16x384xf32>
    %34 = vector.shape_cast %33 : vector<1x16x384xf32> to vector<16x384xf32>
    %35 = arith.truncf %34 : vector<16x384xf32> to vector<16x384xbf16>
    %c0_43 = arith.constant 0 : index
    %c0_44 = arith.constant 0 : index
    %36 = vector.load %arg6[%c0_43, %c0_44] : memref<384x128xbf16, #tpu.memory_space<vmem>>, vector<384x128xbf16>
    %cst_45 = arith.constant dense<0.000000e+00> : vector<16x128xf32>
    %37 = tpu.matmul %35, %36, %cst_45 {dimension_numbers = #tpu.dot_dimension_numbers<[1], [0], [0], [1], [0, 0, 1, 1], [], []>} : vector<16x384xbf16>, vector<384x128xbf16>, vector<16x128xf32> -> vector<16x128xf32>
    %c0_46 = arith.constant 0 : index
    %c0_47 = arith.constant 0 : index
    %38 = vector.load %arg7[%c0_46, %c0_47] : memref<1x128xf32, #tpu.memory_space<vmem>>, vector<1x128xf32>
    %39 = vector.broadcast %38 : vector<1x128xf32> to vector<16x128xf32>
    %40 = arith.addf %37, %39 : vector<16x128xf32>
    %cst_48 = arith.constant 0.000000e+00 : f32
    %41 = vector.broadcast %cst_48 : f32 to vector<16x128xf32>
    %42 = arith.maximumf %40, %41 : vector<16x128xf32>
    %c0_49 = arith.constant 0 : index
    %c8_50 = arith.constant 8 : index
    %c0_51 = arith.constant 0 : index
    %43 = vector.load %arg11[%c0_49, %c8_50, %c0_51] : memref<1x32x128xf32, #tpu.memory_space<vmem>>, vector<1x16x128xf32>
    %44 = vector.shape_cast %43 : vector<1x16x128xf32> to vector<16x128xf32>
    %45 = arith.truncf %44 : vector<16x128xf32> to vector<16x128xbf16>
    %c0_52 = arith.constant 0 : index
    %c0_53 = arith.constant 0 : index
    %46 = vector.load %arg8[%c0_52, %c0_53] : memref<128x128xbf16, #tpu.memory_space<vmem>>, vector<128x128xbf16>
    %cst_54 = arith.constant dense<0.000000e+00> : vector<16x128xf32>
    %47 = tpu.matmul %45, %46, %cst_54 {dimension_numbers = #tpu.dot_dimension_numbers<[1], [0], [0], [1], [0, 0, 1, 1], [], []>} : vector<16x128xbf16>, vector<128x128xbf16>, vector<16x128xf32> -> vector<16x128xf32>
    %c0_55 = arith.constant 0 : index
    %c0_56 = arith.constant 0 : index
    %48 = vector.load %arg9[%c0_55, %c0_56] : memref<1x128xf32, #tpu.memory_space<vmem>>, vector<1x128xf32>
    %49 = vector.broadcast %48 : vector<1x128xf32> to vector<16x128xf32>
    %50 = arith.addf %47, %49 : vector<16x128xf32>
    %51 = arith.addf %42, %50 : vector<16x128xf32>
    %52 = vector.shape_cast %51 : vector<16x128xf32> to vector<1x16x128xf32>
    %c0_57 = arith.constant 0 : index
    %c0_58 = arith.constant 0 : index
    %c0_59 = arith.constant 0 : index
    %53 = vector.load %arg10[%c0_57, %c0_58, %c0_59] : memref<1x16x128xf32, #tpu.memory_space<vmem>>, vector<1x16x128xf32>
    tpu.vector_store %arg10[%c0_57, %c0_58, %c0_59], %52 {strides = array<i32>} : memref<1x16x128xf32, #tpu.memory_space<vmem>>, vector<1x16x128xf32>,
    return
  }
  func.func @transform_0(%arg0: i32) -> (i32, i32, i32) {
    %c0_i32 = arith.constant 0 : i32
    %c0_i32_0 = arith.constant 0 : i32
    %c0_i32_1 = arith.constant 0 : i32
    return %arg0, %c0_i32, %c0_i32_0 : i32, i32, i32
  }
  func.func @transform_1(%arg0: i32) -> (i32, i32) {
    %c0_i32 = arith.constant 0 : i32
    %c0_i32_0 = arith.constant 0 : i32
    %c0_i32_1 = arith.constant 0 : i32
    return %c0_i32, %c0_i32_0 : i32, i32
  }
  func.func @transform_2(%arg0: i32) -> (i32, i32) {
    %c0_i32 = arith.constant 0 : i32
    %c0_i32_0 = arith.constant 0 : i32
    %c0_i32_1 = arith.constant 0 : i32
    return %c0_i32, %c0_i32_0 : i32, i32
  }
  func.func @transform_3(%arg0: i32) -> (i32, i32) {
    %c0_i32 = arith.constant 0 : i32
    %c0_i32_0 = arith.constant 0 : i32
    %c0_i32_1 = arith.constant 0 : i32
    return %c0_i32, %c0_i32_0 : i32, i32
  }
  func.func @transform_4(%arg0: i32) -> (i32, i32) {
    %c0_i32 = arith.constant 0 : i32
    %c0_i32_0 = arith.constant 0 : i32
    %c0_i32_1 = arith.constant 0 : i32
    return %c0_i32, %c0_i32_0 : i32, i32
  }
  func.func @transform_5(%arg0: i32) -> (i32, i32) {
    %c0_i32 = arith.constant 0 : i32
    %c0_i32_0 = arith.constant 0 : i32
    %c0_i32_1 = arith.constant 0 : i32
    return %c0_i32, %c0_i32_0 : i32, i32
  }
  func.func @transform_6(%arg0: i32) -> (i32, i32) {
    %c0_i32 = arith.constant 0 : i32
    %c0_i32_0 = arith.constant 0 : i32
    %c0_i32_1 = arith.constant 0 : i32
    return %c0_i32, %c0_i32_0 : i32, i32
  }
  func.func @transform_7(%arg0: i32) -> (i32, i32) {
    %c0_i32 = arith.constant 0 : i32
    %c0_i32_0 = arith.constant 0 : i32
    %c0_i32_1 = arith.constant 0 : i32
    return %c0_i32, %c0_i32_0 : i32, i32
  }
  func.func @transform_8(%arg0: i32) -> (i32, i32) {
    %c0_i32 = arith.constant 0 : i32
    %c0_i32_0 = arith.constant 0 : i32
    %c0_i32_1 = arith.constant 0 : i32
    return %c0_i32, %c0_i32_0 : i32, i32
  }
  func.func @transform_9(%arg0: i32) -> (i32, i32, i32) {
    %c0_i32 = arith.constant 0 : i32
    %c0_i32_0 = arith.constant 0 : i32
    %c0_i32_1 = arith.constant 0 : i32
    return %arg0, %c0_i32, %c0_i32_0 : i32, i32, i32
  }
}

</mosaic_0001>

<bundles_post_ra>
// kernel: tpu_custom_call.1
= control target key start
LH: loop header
LB: loop body
LE: loop exit
PB: predicated region body
PF: predicated region fallthrough
CT: control target
= control target key end

     0   :  { %s2134_s0 = inlined_call_operand.hbm [shape: f32[2,16,128], index: 0, kind: input, shape index: {}]   ;;  %s2135_s1 = inlined_call_operand.hbm [shape: bf16[384,128], index: 1, kind: input, shape index: {}]   ;;  %s2136_s2 = inlined_call_operand.vmem [shape: f32[1,128], index: 2, kind: input, shape index: {}]   ;;  %s2137_s3 = inlined_call_operand.hbm [shape: bf16[128,128], index: 3, kind: input, shape index: {}]   ;;  %s2138_s4 = inlined_call_operand.vmem [shape: f32[1,128], index: 4, kind: input, shape index: {}]   ;;  %s2139_s5 = inlined_call_operand.hbm [shape: bf16[384,128], index: 5, kind: input, shape index: {}]   ;;  %s2140_s6 = inlined_call_operand.vmem [shape: f32[1,128], index: 6, kind: input, shape index: {}]   ;;  %s2141_s7 = inlined_call_operand.hbm [shape: bf16[128,128], index: 7, kind: input, shape index: {}]   ;;  %s2142_s8 = inlined_call_operand.vmem [shape: f32[1,128], index: 8, kind: input, shape index: {}]   ;;  %s2143_s9 = inlined_call_operand.hbm [shape: f32[2,16,128], index: 9, kind: output, shape index: {}]  }
   0x1   :  { %2144 = sst [smem:[#allocation17_spill]] %s2135_s1 }
   0x2   :  { %2145 = sst [smem:[#allocation18_spill]] %s2137_s3 }
   0x3   :  { %2146 = sst [smem:[#allocation19_spill]] %s2139_s5 }
   0x4   :  { %14 = vsyncpa [#allocation4], 0 }
   0x5   :  { %16 = vsyncpa [#allocation4 + $0x1], 0 }
   0x6   :  { %17 = vsyncpa [#allocation7], 0 }
   0x7   :  { %18 = vsyncpa [#allocation10], 0 }
   0x8   :  { %19 = vsyncpa [#allocation5], 0 }
   0x9   :  { %21 = vsyncpa [#allocation5 + $0x1], 0  ;;  %s1951_s30 = smov 0   ;;  %s1953_s10 = smov 0  }
   0xa   :  { %s1955_s11 = smov 0   ;;  %s1957_s12 = smov 0  }
   0xb LB: > { %s1972_s13 = sadd.s32 4294967295, %s1888_s12   ;;  %s1222_s14 = sadd.s32 4294967294, %s1888_s12   ;;  %s1888_s12 = sphi %s1957_s12, %s2160_s12   ;;  %s1884_s11 = sphi %s1955_s11, %s2159_s11   ;;  %s1880_s10 = sphi %s1953_s10, %s2158_s10   ;;  %s1876_s30 = sphi %s1951_s30, %s2157_s30  }
   0xc   : > { %p47_p0 = scmp.ne.s32.totalorder %s1880_s10, %s1876_s30  ;;  %p48_p1 = scmp.eq.s32.totalorder %s1972_s13, 0 }
   0xd   : > { %p239_p2 = scmp.eq.s32.totalorder %s1972_s13, 1  ;;  %p245_p3 = scmp.eq.s32.totalorder %s1222_s14, 1 }
   0xe   : > { %p1981_p4 = por %p48_p1, %p47_p0  ;;  %p1223_p5 = scmp.ge.s32.totalorder %s1888_s12, 1 }
   0xf   : > { %p1986_p6 = por %p245_p3, %p47_p0  ;;  %p252_p7 = scmp.lt.s32.totalorder %s1888_s12, 3 }
  0x10   : > { %s2149_s1 = sld [smem:[#allocation17_spill]]  ;;  %s1890_s21 = smov [#allocation6]  }
  0x11   : > { %p1994_p8 = pnand %p1223_p5, %p252_p7  ;;  %s265_s22 = sshll.u32 %s1890_s21, 4  ;;  %s266_s22 = int_to_ptr.vmem [resolvable:$true] %s265_s22 }
  0x12   : > { %s2152_s5 = sld [smem:[#allocation19_spill]]  ;;  %s1891_s27 = smov 64  }
  0x13   : > { %p1586_p9 = pneg %p1994_p8  ;;  %s1892_s28 = smov 4  }
  0x14   : > { %s1893_s29 = smov [#allocation9]   ;;  %s2153_s3 = sld [smem:[#allocation18_spill]] }
  0x15   : > { %p2002_p10 = pnand %p1586_p9, %p48_p1  ;;  %s299_s14 = sshll.u32 %s1893_s29, 4  ;;  %s300_s14 = int_to_ptr.vmem [resolvable:$true] %s299_s14 }
  0x16   : > { %s263_s19 = sshll.u32 %s2149_s1, 4  ;;  %s1895_s17 = smov [#allocation11]   ;;  %s264_s19 = int_to_ptr.hbm [resolvable:$true] %s263_s19 }
  0x17   : > { %1589 = dma.hbm_to_vmem [thread:$0]  (!%p2002_p10), %s264_s19, 3072, %s266_s22, [#allocation7], %s1891_s27, %s1891_s27, %s1892_s28  }
  0x18   : > { %s297_s26 = sshll.u32 %s2152_s5, 4  ;;  %s314_s19 = sshll.u32 %s2141_s7, 4  ;;  %s298_s26 = int_to_ptr.hbm [resolvable:$true] %s297_s26  ;;  %s315_s19 = int_to_ptr.hbm [resolvable:$true] %s314_s19 }
  0x19   : > { %1595 = dma.hbm_to_vmem [thread:$0]  (!%p2002_p10), %s298_s26, 3072, %s300_s14, [#allocation10], %s1891_s27, %s1891_s27, %s1892_s28  }
  0x1a   : > { %s280_s21 = sshll.u32 %s2153_s3, 4  ;;  %s1894_s22 = smov [#allocation8]   ;;  %s281_s21 = int_to_ptr.hbm [resolvable:$true] %s280_s21 }
  0x1b   : > { %s282_s29 = sshll.u32 %s1894_s22, 4  ;;  %s316_s18 = sshll.u32 %s1895_s17, 4  ;;  %s283_s29 = int_to_ptr.vmem [resolvable:$true] %s282_s29  ;;  %s317_s18 = int_to_ptr.vmem [resolvable:$true] %s316_s18 }
  0x1c   : > { %1592 = dma.hbm_to_vmem [thread:$0]  (!%p2002_p10), %s281_s21, 1024, %s283_s29, [#allocation7], %s1891_s27, %s1891_s27, %s1892_s28  }
  0x1d   : > { %1598 = dma.hbm_to_vmem [thread:$0]  (!%p2002_p10), %s315_s19, 1024, %s317_s18, [#allocation10], %s1891_s27, %s1891_s27, %s1892_s28  }
  0x1e   : > { %s2025_s26 = sadd.s32 1, %s1888_s12   ;;  %s34_s14 = sadd.s32 1, %s1884_s11 }
  0x1f   : > { %s31_s24 = ssub.s32 %s1888_s12, %s2025_s26  ;;  %p41_p12 = scmp.ne.s32.totalorder %s1884_s11, %s1880_s10 }
  0x20   : > { %p32_p13 = scmp.eq.s32.totalorder %s31_s24, 0  ;;  %p42_p0 = scmp.eq.s32.totalorder %s1888_s12, 0 }
  0x21   : > { %p2035_p3 = por %p239_p2, %p41_p12  ;;  %p1611_p5 = scmp.lt.s32.totalorder %s1888_s12, 2 }
  0x22   : > { %s2041_s21 = scalar_select %p32_p13, %s1884_s11, %s34_s14  }
  0x23   : > { %p43_p7 = por %p42_p0, %p41_p12  ;;  %s333_s22 = sand.u32 1, %s1884_s11  }
  0x24   : > { %s1229_s23 = sshll.u32 %s333_s22, 4  ;;  %s1500_s27 = sshll.u32 %s1888_s12, 4 }
  0x25   : > { %s342_s29 = scalar_lea.hbm %s2134_s0, %s1500_s27  ;;  %s337_s17 = scalar_lea.vmem [#allocation3], %s1229_s23 }
  0x26   : > { %s345_s18 = sshll.u32 %s337_s17, 4  ;;  %s343_s24 = sshll.u32 %s342_s29, 4  ;;  %s346_s18 = int_to_ptr.vmem [resolvable:$true] %s345_s18  ;;  %s344_s24 = int_to_ptr.hbm [resolvable:$true] %s343_s24 }
  0x27   : > { %p2048_p2 = pnand %p1611_p5, %p43_p7  ;;  %s334_s14 = scalar_lea.sflag [#allocation4], %s333_s22 }
  0x28   : > { %s1784_s3 = sshra.s32 %s344_s24, 4  ;;  %s1791_s28 = scalar_lea.hbm %s2134_s0, 32  ;;  %s1785_s3 = int_to_ptr.hbm [resolvable:$true] %s1784_s3 }
  0x29   : > { %s1786_s5 = scalar_lea.hbm %s1785_s3, 16  ;;  %p1788_p10 = pneg %p2048_p2 }
  0x2a   : > { %p1787_p9 = scmp.ne.s32.totalorder %s1785_s3, %s1786_s5  ;;  %p1792_p0 = scmp.lt.s32.totalorder %s1785_s3, %s2134_s0 }
  0x2b   : > { %p1793_p5 = scmp.lt.s32.totalorder %s1791_s28, %s1786_s5 }
  0x2c   : > { %p1789_p12 = pnand %p1788_p10, %p1787_p9 }
  0x2d   : > { %p1794_p7 = por %p1793_p5, %p1792_p0 }
  0x2e   : > { %p1790_p13 = pneg %p1789_p12 }
  0x30   : > { %p1795_p11 = pnand %p1794_p7, %p1790_p13 }
  0x32   : > { %1798 = shalt.err (!%p1795_p11)
}
  0x33   : > { %s1896_s22 = smov 128   ;;  %s1897_s17 = smov 8  }
  0x34   : > { %1602 = dma.hbm_to_vmem [thread:$0]  (!%p2048_p2), %s344_s24, 256, %s346_s18, %s334_s14, %s1896_s22, %s1896_s22, %s1897_s17  }
  0x35   : > { %357 = sbr.rel (%p1994_p8) target bundleno = 404 (0x194), region = 56  ;;  %s2065_s27 = sand.u32 (!%p1994_p8), 1, %s1880_s10  }
  0x36   : > { %s1233_s3 = sshll.u32 (!%p1994_p8), %s2065_s27, 4  ;;  %s360_s5 = scalar_lea.sflag (!%p1994_p8), [#allocation4], %s2065_s27 }
  0x37   : > { %s2071_s23 = scalar_lea.vmem (!%p1994_p8), [#allocation3], %s1233_s3 }
  0x3a   : > { %1859 = dma.done.wait (%p1981_p4), %s360_s5, 256  }
  0x3b   : > { %1861 = vsyncadd (%p1981_p4), %s360_s5, 4294967040 }
  0x3c   : > { %1863 = dma.done.wait (%p48_p1), [#allocation7], 4096  }
  0x3d   : > { %1865 = vsyncadd (%p48_p1), [#allocation7], 4294963200 }
  0x3e   : > { %1867 = dma.done.wait (%p48_p1), [#allocation10], 4096  }
  0x3f   : > { %1869 = vsyncadd (%p48_p1), [#allocation10], 4294963200  ;;  %v1898_v0 = vmov 0.0   ;;  %v1508_v1 = vld [vmem:[#allocation6 + $0x38] sm:$0xff]  ;;  %v1507_v5 = vld [vmem:[#allocation6 + $0x30] sm:$0xff]  ;;  %s1565_s29 = sshll.u32 %s1972_s13, 4 }
  0x40   : > { %419 = vst [vmem:[#allocation2] sm:$0xff] %v1898_v0  ;;  %v1516_v2 = vld [vmem:[#allocation6 + $0x78] sm:$0xff]  ;;  %630 = vmatpush.bf16.msra.mxu0 %v1508_v1  ;;  %v1515_v6 = vld [vmem:[#allocation6 + $0x70] sm:$0xff]  ;;  %v1506_v9 = vld [vmem:[#allocation6 + $0x28] sm:$0xff]  ;;  %s1107_s5 = scalar_lea.hbm %s2143_s9, %s1565_s29  ;;  %s1096_s13 = scalar_lea.sflag [#allocation5], %s2065_s27 }
  0x41   : > { %420 = vst [vmem:[#allocation2 + $0x18] sm:$0xff] %v1898_v0  ;;  %v1524_v3 = vld [vmem:[#allocation6 + $0xb8] sm:$0xff]  ;;  %644 = vmatpush.bf16.msra.mxu1 %v1516_v2  ;;  %v1523_v7 = vld [vmem:[#allocation6 + $0xb0] sm:$0xff]  ;;  %v1514_v10 = vld [vmem:[#allocation6 + $0x68] sm:$0xff]  ;;  %s1110_s15 = sshll.u32 %s1107_s5, 4  ;;  %s1834_s14 = scalar_lea.hbm %s2143_s9, 32  ;;  %s1111_s15 = int_to_ptr.hbm [resolvable:$true] %s1110_s15 }
  0x42   : > { %v1532_v4 = vld [vmem:[#allocation8 + $0x38] sm:$0xff]  ;;  %658 = vmatpush.bf16.msra.mxu2 %v1524_v3  ;;  %v1531_v8 = vld [vmem:[#allocation8 + $0x30] sm:$0xff]  ;;  %v1522_v11 = vld [vmem:[#allocation6 + $0xa8] sm:$0xff]  ;;  %s1828_s20 = sshra.s32 %s1111_s15, 4  ;;  %s1829_s20 = int_to_ptr.hbm [resolvable:$true] %s1828_s20 }
  0x43   : > { %742 = vmatpush.bf16.msra.mxu3 %v1532_v4  ;;  %v1530_v12 = vld [vmem:[#allocation8 + $0x28] sm:$0xff]  ;;  %v1505_v13 = vld [vmem:[#allocation6 + $0x20] sm:$0xff]  ;;  %v1504_v19 = vld [vmem:[#allocation6 + $0x18] sm:$0xff]  ;;  %s1830_s18 = scalar_lea.hbm %s1829_s20, 16  ;;  %p1835_p11 = scmp.lt.s32.totalorder %s1829_s20, %s2143_s9 }
  0x44   : > { %631 = vmatpush.bf16.msra.mxu0 %v1507_v5  ;;  %v1513_v14 = vld [vmem:[#allocation6 + $0x60] sm:$0xff]  ;;  %v422_v18 = vld [vmem:[%s2071_s23 + $0x8] sm:$0xff]  ;;  %v1503_v23 = vld [vmem:[#allocation6 + $0x10] sm:$0xff]  ;;  %p1831_p1 = scmp.ne.s32.totalorder %s1829_s20, %s1830_s18  ;;  %p1836_p2 = scmp.lt.s32.totalorder %s1834_s14, %s1830_s18 }
  0x45   : > { %645 = vmatpush.bf16.msra.mxu1 %v1515_v6  ;;  %v1521_v15 = vld [vmem:[#allocation6 + $0xa0] sm:$0xff]  ;;  %424 = vst [vmem:[#allocation2 + $0x10] sm:$0xff] %v422_v18  ;;  %v1512_v20 = vld [vmem:[#allocation6 + $0x58] sm:$0xff]  ;;  %v1511_v24 = vld [vmem:[#allocation6 + $0x50] sm:$0xff] }
  0x46   : > { %659 = vmatpush.bf16.msra.mxu2 %v1523_v7  ;;  %v421_v16 = vld [vmem:[%s2071_s23] sm:$0xff]  ;;  %v1520_v21 = vld [vmem:[#allocation6 + $0x98] sm:$0xff]  ;;  %v1502_v27 = vld [vmem:[#allocation6 + $0x8] sm:$0xff]  ;;  %s418_s23 = scalar_lea.vmem [#allocation12], %s1233_s3  ;;  %p1832_p4 = pnand %p1831_p1, %p2035_p3 }
  0x47   : > { %743 = vmatpush.bf16.msra.mxu3 %v1531_v8  ;;  %v1529_v17 = vld [vmem:[#allocation8 + $0x20] sm:$0xff]  ;;  %423 = vst [vmem:[#allocation2 + $0x8] sm:$0xff] %v421_v16  ;;  %v1528_v22 = vld [vmem:[#allocation8 + $0x18] sm:$0xff]  ;;  %v1519_v25 = vld [vmem:[#allocation6 + $0x90] sm:$0xff]  ;;  %v432_v40 = vpack.c.bf16 %v422_v18, %v421_v16  ;;  %s1108_s1 = sshll.u32 %s418_s23, 4  ;;  %p1837_p9 = por %p1836_p2, %p1835_p11  ;;  %s1109_s1 = int_to_ptr.vmem [resolvable:$true] %s1108_s1 }
  0x48   : > { %632 = vmatpush.bf16.msra.mxu0 %v1506_v9  ;;  %v1527_v26 = vld [vmem:[#allocation8 + $0x10] sm:$0xff]  ;;  %v1510_v28 = vld [vmem:[#allocation6 + $0x48] sm:$0xff]  ;;  %v1501_v31 = vld [vmem:[#allocation6] sm:$0xff]  ;;  %p1833_p8 = pneg %p1832_p4 }
  0x49   : > { %646 = vmatpush.bf16.msra.mxu1 %v1514_v10  ;;  %v1518_v29 = vld [vmem:[#allocation6 + $0x88] sm:$0xff]  ;;  %v1509_v32 = vld [vmem:[#allocation6 + $0x40] sm:$0xff]  ;;  %v1548_v42 = vld [vmem:[#allocation9 + $0x78] sm:$0xff] }
  0x4a   : > { %660 = vmatpush.bf16.msra.mxu2 %v1522_v11  ;;  %v1526_v30 = vld [vmem:[#allocation8 + $0x8] sm:$0xff]  ;;  %v1517_v33 = vld [vmem:[#allocation6 + $0x80] sm:$0xff]  ;;  %v1564_v43 = vld [vmem:[#allocation11 + $0x38] sm:$0xff]  ;;  %p1838_p10 = pnand %p1837_p9, %p1833_p8 }
  0x4b   : > { %744 = vmatpush.bf16.msra.mxu3 %v1530_v12  ;;  %v1525_v36 = vld [vmem:[#allocation8] sm:$0xff]  ;;  %v1547_v44 = vld [vmem:[#allocation9 + $0x70] sm:$0xff]  ;;  %v1540_v46 = vld [vmem:[#allocation9 + $0x38] sm:$0xff] }
  0x4c   : > { %633 = vmatpush.bf16.msra.mxu0 %v1505_v13  ;;  %v430_v38 = vld [vmem:[#allocation2 + $0x11] sm:$0xff]  ;;  %v1546_v48 = vld [vmem:[#allocation9 + $0x68] sm:$0xff]  ;;  %v1545_v52 = vld [vmem:[#allocation9 + $0x60] sm:$0xff] }
  0x4d   : > { %647 = vmatpush.bf16.msra.mxu1 %v1513_v14  ;;  %v1563_v45 = vld [vmem:[#allocation11 + $0x30] sm:$0xff]  ;;  %v1556_v47 = vld [vmem:[#allocation9 + $0xb8] sm:$0xff]  ;;  %v1562_v49 = vld [vmem:[#allocation11 + $0x28] sm:$0xff] }
  0x4e   : > { %661 = vmatpush.bf16.msra.mxu2 %v1521_v15  ;;  %v425_v34 = vld [vmem:[#allocation2 + $0x7] sm:$0xff]  ;;  %v426_v35 = vld [vmem:[#allocation2 + $0xf] sm:$0xff]  ;;  %v1544_v56 = vld [vmem:[#allocation9 + $0x58] sm:$0xff] }
  0x4f   : > { %745 = vmatpush.bf16.msra.mxu3 %v1529_v17  ;;  %v429_v37 = vld [vmem:[#allocation2 + $0x9] sm:$0xff]  ;;  %v431_v39 = vpack.c.bf16 %v426_v35, %v425_v34  ;;  %v1561_v53 = vld [vmem:[#allocation11 + $0x20] sm:$0xff]  ;;  %v1560_v57 = vld [vmem:[#allocation11 + $0x18] sm:$0xff] }
  0x50   : > { %634 = vmatpush.bf16.msra.mxu0 %v1504_v19  ;;  %v433_v41 = vpack.c.bf16 %v430_v38, %v429_v37  ;;  %v1539_v50 = vld [vmem:[#allocation9 + $0x30] sm:$0xff]  ;;  %v1538_v54 = vld [vmem:[#allocation9 + $0x28] sm:$0xff]  ;;  %v1537_v58 = vld [vmem:[#allocation9 + $0x20] sm:$0xff] }
  0x51   : > { %648 = vmatpush.bf16.msra.mxu1 %v1512_v20  ;;  %v1555_v51 = vld [vmem:[#allocation9 + $0xb0] sm:$0xff]  ;;  %v1554_v55 = vld [vmem:[#allocation9 + $0xa8] sm:$0xff]  ;;  %v1553_v59 = vld [vmem:[#allocation9 + $0xa0] sm:$0xff] }
  0x52   : > { %662 = vmatpush.bf16.msra.mxu2 %v1520_v21  ;;  %v1543_v60 = vld [vmem:[#allocation9 + $0x50] sm:$0xff]  ;;  %v1536_v62 = vld [vmem:[#allocation9 + $0x18] sm:$0xff]  ;;  %v1542_v0 = vld [vmem:[#allocation9 + $0x48] sm:$0xff] }
  0x53   : > { %746 = vmatpush.bf16.msra.mxu3 %v1528_v22  ;;  %v1559_v61 = vld [vmem:[#allocation11 + $0x10] sm:$0xff]  ;;  %v1552_v63 = vld [vmem:[#allocation9 + $0x98] sm:$0xff]  ;;  %v1558_v1 = vld [vmem:[#allocation11 + $0x8] sm:$0xff] }
  0x54   : > { %635 = vmatpush.bf16.msra.mxu0 %v1503_v23  ;;  %v1535_v2 = vld [vmem:[#allocation9 + $0x10] sm:$0xff]  ;;  %v1541_v4 = vld [vmem:[#allocation9 + $0x40] sm:$0xff]  ;;  %v1534_v6 = vld [vmem:[#allocation9 + $0x8] sm:$0xff] }
  0x55   : > { %649 = vmatpush.bf16.msra.mxu1 %v1511_v24  ;;  %v1551_v3 = vld [vmem:[#allocation9 + $0x90] sm:$0xff]  ;;  %v1557_v5 = vld [vmem:[#allocation11] sm:$0xff]  ;;  %v1550_v7 = vld [vmem:[#allocation9 + $0x88] sm:$0xff] }
  0x56   : > { %663 = vmatpush.bf16.msra.mxu2 %v1519_v25  ;;  %v1533_v8 = vld [vmem:[#allocation9] sm:$0xff] }
  0x57   : > { %747 = vmatpush.bf16.msra.mxu3 %v1527_v26  ;;  %v1549_v9 = vld [vmem:[#allocation9 + $0x80] sm:$0xff] }
  0x58   : > { %636 = vmatpush.bf16.msra.mxu0 %v1502_v27  ;;  %v1660_v10 = vld [vmem:[%s2136_s2] ss:$0 sm:$0xff] }
  0x59   : > { %650 = vmatpush.bf16.msra.mxu1 %v1510_v28  ;;  %v1661_v15 = vld [vmem:[%s2138_s4] ss:$0 sm:$0xff] }
  0x5a   : > { %664 = vmatpush.bf16.msra.mxu2 %v1518_v29 }
  0x5b   : > { %748 = vmatpush.bf16.msra.mxu3 %v1526_v30 }
  0x5c   : > { %637 = vmatpush.bf16.msra.mxu0 %v1501_v31 }
  0x5d   : > { %651 = vmatpush.bf16.msra.mxu1 %v1509_v32 }
  0x5e   : > { %665 = vmatpush.bf16.msra.mxu2 %v1517_v33 }
  0x5f   : > { %749 = vmatpush.bf16.msra.mxu3 %v1525_v36  ;;  %638 = vmatmul.bf16.vlgmr.msra.gmra.mxu0 %v431_v39  ;;  %v1662_v39 = vld [vmem:[%s2140_s6] ss:$0 sm:$0xff] }
  0x60   : > { %652 = vmatmul.bf16.vlgmr.msra.gmra.mxu1 %v432_v40  ;;  %965 = vmatpush.bf16.msrb.mxu0 %v1540_v46 }
  0x61   : > { %666 = vmatmul.bf16.vlgmr.msra.gmra.mxu2 %v433_v41  ;;  %979 = vmatpush.bf16.msrb.mxu1 %v1548_v42 }
  0x62   : > { %750 = vmatmul.bf16.vlgmr.msra.gmra.mxu3 %v432_v40  ;;  %993 = vmatpush.bf16.msrb.mxu2 %v1556_v47 }
  0x63   : > { %1077 = vmatpush.bf16.msrb.mxu3 %v1564_v43 }
  0x64   : > { %966 = vmatpush.bf16.msrb.mxu0 %v1539_v50 }
  0x65   : > { %980 = vmatpush.bf16.msrb.mxu1 %v1547_v44 }
  0x66   : > { %994 = vmatpush.bf16.msrb.mxu2 %v1555_v51 }
  0x67   : > { %1078 = vmatpush.bf16.msrb.mxu3 %v1563_v45  ;;  %v1663_v45 = vld [vmem:[%s2142_s8] ss:$0 sm:$0xff] }
  0x68   : > { %967 = vmatpush.bf16.msrb.mxu0 %v1538_v54 }
  0x69   : > { %981 = vmatpush.bf16.msrb.mxu1 %v1546_v48 }
  0x6a   : > { %995 = vmatpush.bf16.msrb.mxu2 %v1554_v55 }
  0x6b   : > { %1079 = vmatpush.bf16.msrb.mxu3 %v1562_v49 }
  0x6c   : > { %968 = vmatpush.bf16.msrb.mxu0 %v1537_v58 }
  0x6d   : > { %982 = vmatpush.bf16.msrb.mxu1 %v1545_v52 }
  0x6e   : > { %996 = vmatpush.bf16.msrb.mxu2 %v1553_v59 }
  0x6f   : > { %1080 = vmatpush.bf16.msrb.mxu3 %v1561_v53 }
  0x70   : > { %969 = vmatpush.bf16.msrb.mxu0 %v1536_v62 }
  0x71   : > { %983 = vmatpush.bf16.msrb.mxu1 %v1544_v56 }
  0x72   : > { %997 = vmatpush.bf16.msrb.mxu2 %v1552_v63 }
  0x73   : > { %1081 = vmatpush.bf16.msrb.mxu3 %v1560_v57 }
  0x74   : > { %970 = vmatpush.bf16.msrb.mxu0 %v1535_v2 }
  0x75   : > { %984 = vmatpush.bf16.msrb.mxu1 %v1543_v60 }
  0x76   : > { %998 = vmatpush.bf16.msrb.mxu2 %v1551_v3 }
  0x77   : > { %1082 = vmatpush.bf16.msrb.mxu3 %v1559_v61 }
  0x78   : > { %971 = vmatpush.bf16.msrb.mxu0 %v1534_v6 }
  0x79   : > { %985 = vmatpush.bf16.msrb.mxu1 %v1542_v0 }
  0x7a   : > { %999 = vmatpush.bf16.msrb.mxu2 %v1550_v7 }
  0x7b   : > { %1083 = vmatpush.bf16.msrb.mxu3 %v1558_v1 }
  0x7c   : > { %972 = vmatpush.bf16.msrb.mxu0 %v1533_v8 }
  0x7d   : > { %986 = vmatpush.bf16.msrb.mxu1 %v1541_v4 }
  0x7e   : > { %1000 = vmatpush.bf16.msrb.mxu2 %v1549_v9 }
  0x7f   : > { %1084 = vmatpush.bf16.msrb.mxu3 %v1557_v5 }
  0xdc   : > { %v639_v11 = vpop.f32.mrf.mxu0 }
  0xdd   : > { %v640_v12 = vadd.f32 %v1660_v10, %v639_v11  ;;  %v653_v13 = vpop.f32.mrf.mxu1 }
  0xdf   : > { %v654_v14 = vadd.f32 %v653_v13, %v640_v12 }
  0xe4   : > { %v667_v16 = vpop.f32.mrf.mxu2  ;;  %v641_v20 = vpop.f32.mrf.mxu0 }
  0xe5   : > { %v751_v17 = vpop.f32.mrf.mxu3  ;;  %v668_v18 = vadd.f32 %v667_v16, %v654_v14  ;;  %v642_v22 = vadd.f32 %v1660_v10, %v641_v20  ;;  %v655_v24 = vpop.f32.mrf.mxu1 }
  0xe6   : > { %v752_v19 = vadd.f32 %v1661_v15, %v751_v17 }
  0xe7   : > { %v672_v21 = vmax.f32 %v668_v18, 0.0  ;;  %v656_v25 = vadd.f32 %v655_v24, %v642_v22 }
  0xe9   : > { %v756_v23 = vadd.f32 %v752_v19, %v672_v21 }
  0xeb   : > { %758 = vst [vmem:[#allocation2 + $0x8] sm:$0xff] %v756_v23 }
  0xec   : > { %v669_v26 = vpop.f32.mrf.mxu2 }
  0xed   : > { %v753_v27 = vpop.f32.mrf.mxu3  ;;  %v670_v28 = vadd.f32 %v669_v26, %v656_v25 }
  0xee   : > { %v754_v30 = vadd.f32 %v1661_v15, %v753_v27 }
  0xef   : > { %v673_v29 = vmax.f32 %v670_v28, 0.0 }
  0xf1   : > { %v757_v31 = vadd.f32 %v754_v30, %v673_v29 }
  0xf2   : > { %v760_v33 = vld [vmem:[#allocation2 + $0x7] sm:$0xff] }
  0xf3   : > { %759 = vst [vmem:[#allocation2 + $0x10] sm:$0xff] %v757_v31  ;;  %v767_v32 = vpack.c.bf16 %v757_v31, %v756_v23 }
  0xf5   : > { %987 = vmatmul.bf16.vlgmr.msrb.gmra.mxu1 %v767_v32  ;;  %1085 = vmatmul.bf16.vlgmr.msrb.gmra.mxu3 %v767_v32 }
  0xfa   : > { %v761_v34 = vld [vmem:[#allocation2 + $0xf] sm:$0xff] }
  0xfb   : > { %v764_v35 = vld [vmem:[#allocation2 + $0x9] sm:$0xff]  ;;  %v765_v36 = vld [vmem:[#allocation2 + $0x11] sm:$0xff]  ;;  %v766_v37 = vpack.c.bf16 %v761_v34, %v760_v33 }
  0xfc   : > { %v768_v38 = vpack.c.bf16 %v765_v36, %v764_v35 }
  0xfd   : > { %973 = vmatmul.bf16.vlgmr.msrb.gmra.mxu0 %v766_v37 }
  0xfe   : > { %1001 = vmatmul.bf16.vlgmr.msrb.gmra.mxu2 %v768_v38 }
 0x172   : > { %v988_v42 = vpop.f32.mrf.mxu1 }
 0x178   : > { %v1086_v43 = vpop.f32.mrf.mxu3 }
 0x179   : > { %v1087_v50 = vadd.f32 %v1663_v45, %v1086_v43 }
 0x17a   : > { %v974_v40 = vpop.f32.mrf.mxu0  ;;  %v990_v53 = vpop.f32.mrf.mxu1 }
 0x17b   : > { %v975_v41 = vadd.f32 %v1662_v39, %v974_v40 }
 0x17d   : > { %v989_v44 = vadd.f32 %v988_v42, %v975_v41 }
 0x180   : > { %v1088_v56 = vpop.f32.mrf.mxu3 }
 0x181   : > { %v1002_v46 = vpop.f32.mrf.mxu2  ;;  %v1089_v59 = vadd.f32 %v1663_v45, %v1088_v56 }
 0x182   : > { %v1003_v47 = vadd.f32 %v1002_v46, %v989_v44  ;;  %v976_v48 = vpop.f32.mrf.mxu0 }
 0x183   : > { %v977_v51 = vadd.f32 %v1662_v39, %v976_v48 }
 0x184   : > { %v1007_v49 = vmax.f32 %v1003_v47, 0.0 }
 0x185   : > { %v991_v54 = vadd.f32 %v990_v53, %v977_v51 }
 0x186   : > { %v1091_v52 = vadd.f32 %v1087_v50, %v1007_v49 }
 0x188   : > { %1093 = vst [vmem:[%s418_s23] sm:$0xff] %v1091_v52 }
 0x189   : > { %v1004_v55 = vpop.f32.mrf.mxu2 }
 0x18a   : > { %v1005_v57 = vadd.f32 %v1004_v55, %v991_v54 }
 0x18c   : > { %v1008_v58 = vmax.f32 %v1005_v57, 0.0 }
 0x18e   : > { %v1092_v60 = vadd.f32 %v1089_v59, %v1008_v58 }
 0x190   : > { %1094 = vst [vmem:[%s418_s23 + $0x8] sm:$0xff] %v1092_v60 }
 0x191   : > { %1841 = shalt.err (!%p1838_p10)
}
 0x192   : > { %s1899_s27 = smov 128   ;;  %s1900_s29 = smov 8  }
 0x193   : > { %1584 = dma.vmem_to_hbm [thread:$0]  (%p2035_p3), %s1109_s1, 256, %s1111_s15, %s1096_s13, %s1899_s27, %s1899_s27, %s1900_s29  }
 0x194 PF: > { %s1125_s22 = sand.u32 1, %s1876_s30   ;;  %p2156_p12 = scmp.ge.s32.totalorder %s1888_s12, 2 }
 0x195   : > { %s1126_s17 = scalar_lea.sflag [#allocation5], %s1125_s22 }
 0x196   : > { %p1604_p13 = pnand %p2156_p12, %p1986_p6 }
 0x198   : > { %p1605_p0 = pneg %p1604_p13 }
 0x19a   : > { %1871 = dma.done.wait (%p1605_p0), %s1126_s17, 256  }
 0x19b   : > { %1873 = vsyncadd (%p1605_p0), %s1126_s17, 4294967040  ;;  %p24_p5 = scmp.ge.s32.totalorder %s2025_s26, 4   ;;  %s2157_s30 = smov %s1880_s10 }
 0x19c   : > { %s2158_s10 = smov %s1884_s11  ;;  %s2159_s11 = smov %s2041_s21 }
 0x19d   : > { %s2160_s12 = smov %s2025_s26  ;;  %26 = sbr.rel (!%p24_p5) target bundleno = 11 (0xb), region = 117 }
 0x1a2   :  { %1132 = vsyncpa [#allocation4], 1 }
 0x1a3   :  { %1134 = vsyncpa [#allocation4 + $0x1], 1 }
 0x1a4   :  { %1135 = vsyncpa [#allocation7], 1 }
 0x1a5   :  { %1136 = vsyncpa [#allocation10], 1 }
 0x1a6   :  { %1137 = vsyncpa [#allocation5], 1 }
 0x1a7   :  { %1139 = vsyncpa [#allocation5 + $0x1], 1 }

</bundles_post_ra>
